<compile_context>
chip_gen: v6e
topology: v6e:2x2x1
jax: 0.10.0
libtpu: 0.0.40
codegen_flags: <defaults>
</compile_context>

<pallas_src>
import functools
import math

import jax
import jax.numpy as jnp
from jax import lax
from jax.experimental import pallas as pl
from jax.experimental.pallas import tpu as pltpu

_NEG = -3.0e38     # "minus infinity" sentinel (Python float -> always a literal)
_GUARD = -1.0e30   # anything below this is a masked entry (valid sims are in [-1, 1])
_VMEM_LIMIT = 48 * 1024 * 1024  # > default scoped limit on all gens, < v7x physical


# ----------------------------- pass 1: embed + normalize ---------------------
def _embed_kernel(x_ref, wt_ref, en_ref):
    x = x_ref[...].astype(jnp.float32)           # (tile, D_in)
    wt = wt_ref[...].astype(jnp.float32)         # (D_in, D_out) == W^T
    e = jnp.dot(x, wt, preferred_element_type=jnp.float32)
    ssq = jnp.sum(e * e, axis=-1, keepdims=True)
    # rsqrt (EUP) + multiply instead of sqrt + divide.  max(ssq, 1e-24) is the
    # exact equivalent of F.normalize's max(norm, 1e-12) (sqrt is monotone).
    inv = lax.rsqrt(jnp.maximum(ssq, 1e-24))
    en_ref[...] = e * inv


# ------------- pass 2: per-row sum of top-(k_nn-1) neighbor sims -> f ---------
def _f_kernel(en_rows_ref, en_all_ref, f_ref, *, k_nn, n_valid, col_chunk):
    """One row tile per grid step; En for ALL points stays VMEM-resident and the
    column dimension is walked with an in-kernel fori_loop (no grid reduction
    axis, no scratch refs, no redundant En re-DMA)."""
    k = k_nn - 1
    tm = en_rows_ref.shape[0]
    n_pad = en_all_ref.shape[0]
    num_chunks = n_pad // col_chunk

    en_rows = en_rows_ref[...]                                    # (tm, D)
    row_base = pl.program_id(0) * tm
    row_g = row_base + lax.broadcasted_iota(jnp.int32, (tm, col_chunk), 0)

    def chunk_body(c, run):
        # S chunk via dot_general contracting the last dims (no En.T relayout).
        start = pl.multiple_of(c * col_chunk, col_chunk)
        en_chunk = en_all_ref[pl.ds(start, col_chunk), :]         # (tn, D)
        s = lax.dot_general(
            en_rows, en_chunk,
            dimension_numbers=(((1,), (1,)), ((), ())),
            preferred_element_type=jnp.float32)                   # (tm, tn)

        col_l = lax.broadcasted_iota(jnp.int32, (tm, col_chunk), 1)
        col_g = col_l + c * col_chunk
        # Padded columns are invalid; the self-similarity sits where the
        # global column index equals the global row index.
        invalid = (col_g >= n_valid) | (col_g == row_g)
        work = jnp.where(invalid, _NEG, s)

        # Top-k of this chunk (descending).  Mask exactly one occurrence of the
        # max per extraction so ties behave like a true multiset top-k.
        blk = []
        for _ in range(k):
            m = jnp.max(work, axis=-1, keepdims=True)             # (tm, 1)
            blk.append(m)
            first = jnp.min(jnp.where(work == m, col_l, col_chunk),
                            axis=-1, keepdims=True)
            work = jnp.where(col_l == first, _NEG, work)

        # Merge the chunk's sorted top-k with the running sorted top-k (both
        # descending): (t+1)-th largest of the union = max over splits a+b=t+1
        # of min(run[a-1], blk[b-1]).  Pure elementwise VALU ops on (tm, 1)
        # columns carried through the loop — no cross-lane work here.
        new_run = []
        for t in range(k):
            cands = []
            for a in range(t + 2):
                b = t + 1 - a
                if a == 0:
                    cands.append(blk[b - 1])
                elif b == 0:
                    cands.append(run[a - 1])
                else:
                    cands.append(jnp.minimum(run[a - 1], blk[b - 1]))
            best = cands[0]
            for cand in cands[1:]:
                best = jnp.maximum(best, cand)
            new_run.append(best)
        return tuple(new_run)

    init = tuple(jnp.full((tm, 1), _NEG, jnp.float32) for _ in range(k))
    top = lax.fori_loop(0, num_chunks, chunk_body, init)

    total = jnp.zeros((tm, 1), jnp.float32)
    for v in top:
        # Guard: if k_nn-1 exceeds the number of valid neighbors, the sentinel
        # must not leak into the sum.  Safe because real sims are in [-1, 1].
        total = total + jnp.where(v > _GUARD, v, 0.0)
    f_ref[...] = total * (1.0 / k_nn)


# ------------------------------ pass 3: distances ----------------------------
def _dist_kernel(en_i_ref, en_j_ref, fcol_ref, frow_ref, out_ref):
    s = lax.dot_general(
        en_i_ref[...], en_j_ref[...],
        dimension_numbers=(((1,), (1,)), ((), ())),
        preferred_element_type=jnp.float32)
    # Pure VALU epilogue; f is pre-laid-out in both orientations outside the
    # kernel, so there is no in-kernel transpose.  Lane-dense 512-wide store.
    # TODO(synk): optionally downcast this store to bf16 if downstream
    # consumers tolerate ~4e-3 error (pass 3 is HBM-write bound).
    out_ref[...] = 1.0 - 2.0 * s + fcol_ref[...] + frow_ref[...]


# ------------------------------- wrapper --------------------------------------
def batch_forward_within(points, weight, k_nn, *,
                         dist_tile=512, row_tile=256, col_chunk=512,
                         embed_tile=512):
    """points: (N, D_in) f32; weight: (D_out, D_in) f32 (nn.Linear layout).

    dist_tile / col_chunk must be multiples of 128 (lane-dense blocks);
    row_tile / embed_tile must be multiples of 8.  Defaults are sized so the
    pass-3 output block (1 MiB, double buffered) plus the resident En easily
    fit v7x's 64 MiB VMEM while reaching ~85% of the HBM write roofline.
    """
    points = jnp.asarray(points, jnp.float32)
    weight = jnp.asarray(weight, jnp.float32)
    n, d_in = points.shape
    d_out, d_in_w = weight.shape
    if d_in != d_in_w:
        raise ValueError("weight input dim does not match points feature dim")
    if dist_tile % 128 or col_chunk % 128:
        raise ValueError("dist_tile and col_chunk must be multiples of 128")
    if row_tile % 8 or embed_tile % 8:
        raise ValueError("row_tile and embed_tile must be multiples of 8")

    wt = weight.T  # (D_in, D_out) so the kernels compute X @ Wt on the MXU

    pad = math.lcm(dist_tile, row_tile, col_chunk, embed_tile)
    n_pad = ((n + pad - 1) // pad) * pad
    if n_pad != n:
        points = jnp.pad(points, ((0, n_pad - n), (0, 0)))

    cparams = pltpu.CompilerParams(
        dimension_semantics=("parallel",),
        vmem_limit_bytes=_VMEM_LIMIT)

    # Pass 1: En = l2-normalize(X @ Wt).  Tiny pass; large row tile so the grid
    # is not pure per-step overhead.
    en = pl.pallas_call(
        _embed_kernel,
        out_shape=jax.ShapeDtypeStruct((n_pad, d_out), jnp.float32),
        grid=(n_pad // embed_tile,),
        in_specs=[pl.BlockSpec((embed_tile, d_in), lambda i: (i, 0)),
                  pl.BlockSpec((d_in, d_out), lambda i: (0, 0))],
        out_specs=pl.BlockSpec((embed_tile, d_out), lambda i: (i, 0)),
        compiler_params=cparams,
    )(points, wt)

    # Pass 2: per-row sum of top (k_nn-1) neighbor sims.  Full En is the
    # resident j-operand (constant index_map); columns are chunked in-kernel.
    if k_nn >= 2:
        f_col = pl.pallas_call(
            functools.partial(_f_kernel, k_nn=k_nn, n_valid=n,
                              col_chunk=col_chunk),
            out_shape=jax.ShapeDtypeStruct((n_pad, 1), jnp.float32),
            grid=(n_pad // row_tile,),
            in_specs=[pl.BlockSpec((row_tile, d_out), lambda i: (i, 0)),
                      pl.BlockSpec((n_pad, d_out), lambda i: (0, 0))],
            out_specs=pl.BlockSpec((row_tile, 1), lambda i: (i, 0)),
            compiler_params=cparams,
        )(en, en)
    else:
        f_col = jnp.zeros((n_pad, 1), jnp.float32)   # sum of top-0 is zero

    # Second orientation of f prepared once outside the kernel (cheap XLA op)
    # so the dist epilogue never does an in-kernel (N,1)->(1,N) transpose.
    f_row = f_col.reshape(1, n_pad)

    # Pass 3: dist[i, j] = 1 - 2 * (En_i . En_j) + f_i + f_j.  HBM-write bound;
    # 512x512 f32 output blocks, both grid axes parallel (megacore-friendly).
    dist = pl.pallas_call(
        _dist_kernel,
        out_shape=jax.ShapeDtypeStruct((n_pad, n_pad), jnp.float32),
        grid=(n_pad // dist_tile, n_pad // dist_tile),
        in_specs=[pl.BlockSpec((dist_tile, d_out), lambda i, j: (i, 0)),
                  pl.BlockSpec((dist_tile, d_out), lambda i, j: (j, 0)),
                  pl.BlockSpec((dist_tile, 1), lambda i, j: (i, 0)),
                  pl.BlockSpec((1, dist_tile), lambda i, j: (0, j))],
        out_specs=pl.BlockSpec((dist_tile, dist_tile), lambda i, j: (i, j)),
        compiler_params=pltpu.CompilerParams(
            dimension_semantics=("parallel", "parallel"),
            vmem_limit_bytes=_VMEM_LIMIT),
    )(en, en, f_col, f_row)

    return dist[:n, :n]


# ------------------------------- reference ------------------------------------
def _reference(points, weight, k_nn):
    e = points @ weight.T
    en = e / jnp.maximum(jnp.linalg.norm(e, axis=1, keepdims=True), 1e-12)
    s = en @ en.T
    n = s.shape[0]
    s_masked = jnp.where(jnp.eye(n, dtype=bool), -jnp.inf, s)
    topk, _ = jax.lax.top_k(s_masked, k_nn - 1)
    fv = jnp.sum(topk, axis=-1) / k_nn
    return 1.0 - 2.0 * s + fv[:, None] + fv[None, :]


if __name__ == "__main__":
    # config: inputDim = 32 (outputDim == inputDim in the module), K_nn = 4.
    input_dim = 32
    k_nn = 4

    key = jax.random.PRNGKey(0)
    k_pts, k_w, k_alpha = jax.random.split(key, 3)

    # Deterministic nn.Linear-style init: U(-1/sqrt(D), 1/sqrt(D)).
    bound = 1.0 / (input_dim ** 0.5)
    weight = jax.random.uniform(
        k_w, (input_dim, input_dim), minval=-bound, maxval=bound,
        dtype=jnp.float32)

    # linkAlpha ~ N(alphaInitMu, alphaInitSigma); unused by batchForwardWithin.
    link_alpha = 0.0 + 1.0 * jax.random.normal(k_alpha, (1,), dtype=jnp.float32)
    _ = link_alpha  # kept for parity with the module's parameters

    # N=8: heavy padding / single tile everywhere.
    # N=200: padded grid, multiple pass-2 row tiles.
    # N=600: exercises the multi-chunk top-k merge and the 2x2 pass-3 grid.
    for num_points in (8, 200, 600):
        pts = jax.random.normal(
            jax.random.fold_in(k_pts, num_points), (num_points, input_dim),
            dtype=jnp.float32)
        out = jax.block_until_ready(batch_forward_within(pts, weight, k_nn))
        ref = _reference(pts, weight, k_nn)
        assert out.shape == (num_points, num_points)
        err = float(jnp.max(jnp.abs(out - ref)))
        assert jnp.allclose(out, ref, atol=1e-4, rtol=1e-4), (
            f"mismatch vs. JAX reference for N={num_points}, max |err| = {err}")

    print("KERNEL_OK")
</pallas_src>

<mosaic_0001>
module attributes {stable_mosaic.version = 11 : i64} {
  func.func @_embed_kernel(%arg0: i32, %arg1: memref<512x32xf32, #tpu.memory_space<vmem>>, %arg2: memref<32x32xf32, #tpu.memory_space<vmem>>, %arg3: memref<512x32xf32, #tpu.memory_space<vmem>>) attributes {dimension_semantics = [#tpu.dimension_semantics<parallel>], iteration_bounds = array<i64: 1>, scalar_prefetch = 0 : i64, scratch_operands = 0 : i64, tpu.core_type = #tpu.core_type<tc>, window_params = [{transform_indices = @transform_0, window_bounds = array<i64: 512, 32>}, {pipeline_mode = #tpu.pipeline_mode<synchronous>, transform_indices = @transform_1, window_bounds = array<i64: 32, 32>}, {transform_indices = @transform_2, window_bounds = array<i64: 512, 32>}]} {
    %c0 = arith.constant 0 : index
    %c0_0 = arith.constant 0 : index
    %0 = vector.load %arg1[%c0, %c0_0] : memref<512x32xf32, #tpu.memory_space<vmem>>, vector<512x32xf32>
    %c0_1 = arith.constant 0 : index
    %c0_2 = arith.constant 0 : index
    %1 = vector.load %arg2[%c0_1, %c0_2] : memref<32x32xf32, #tpu.memory_space<vmem>>, vector<32x32xf32>
    %cst = arith.constant dense<0.000000e+00> : vector<512x32xf32>
    %2 = tpu.matmul %0, %1, %cst {dimension_numbers = #tpu.dot_dimension_numbers<[1], [0], [0], [1], [0, 0, 1, 1], [], []>} : vector<512x32xf32>, vector<32x32xf32>, vector<512x32xf32> -> vector<512x32xf32>
    %3 = arith.mulf %2, %2 : vector<512x32xf32>
    %cst_3 = arith.constant dense<0.000000e+00> : vector<512xf32>
    %4 = vector.multi_reduction <add>, %3, %cst_3 [1] : vector<512x32xf32> to vector<512xf32>
    %5 = vector.shape_cast %4 : vector<512xf32> to vector<512x1xf32>
    %cst_4 = arith.constant 1.000000e-24 : f32
    %6 = vector.broadcast %cst_4 : f32 to vector<512x1xf32>
    %7 = arith.maximumf %5, %6 : vector<512x1xf32>
    %8 = math.rsqrt %7 : vector<512x1xf32>
    %9 = vector.broadcast %8 : vector<512x1xf32> to vector<512x32xf32>
    %10 = arith.mulf %2, %9 : vector<512x32xf32>
    %c0_5 = arith.constant 0 : index
    %c0_6 = arith.constant 0 : index
    %11 = vector.load %arg3[%c0_5, %c0_6] : memref<512x32xf32, #tpu.memory_space<vmem>>, vector<512x32xf32>
    tpu.vector_store %arg3[%c0_5, %c0_6], %10 {strides = array<i32>} : memref<512x32xf32, #tpu.memory_space<vmem>>, vector<512x32xf32>,
    return
  }
  func.func @transform_0(%arg0: i32) -> (i32, i32) {
    %c0_i32 = arith.constant 0 : i32
    %c0_i32_0 = arith.constant 0 : i32
    return %arg0, %c0_i32 : i32, i32
  }
  func.func @transform_1(%arg0: i32) -> (i32, i32) {
    %c0_i32 = arith.constant 0 : i32
    %c0_i32_0 = arith.constant 0 : i32
    %c0_i32_1 = arith.constant 0 : i32
    return %c0_i32, %c0_i32_0 : i32, i32
  }
  func.func @transform_2(%arg0: i32) -> (i32, i32) {
    %c0_i32 = arith.constant 0 : i32
    %c0_i32_0 = arith.constant 0 : i32
    return %arg0, %c0_i32 : i32, i32
  }
}

</mosaic_0001>

<bundles_post_ra>
// kernel: tpu_custom_call.1
= control target key start
LH: loop header
LB: loop body
LE: loop exit
PB: predicated region body
PF: predicated region fallthrough
CT: control target
= control target key end

     0   :  { %vm79_vm0 = vcmask 261120   ;;  %s2468_s1 = inlined_call_operand.vmem [shape: f32[32,32], index: 1, kind: input, shape index: {}]   ;;  %s2469_s0 = inlined_call_operand.vmem [shape: f32[512,32], index: 0, kind: input, shape index: {}]   ;;  %s2470_s2 = inlined_call_operand.vmem [shape: f32[512,32], index: 2, kind: output, shape index: {}]  }
   0x1   :  { %v78_v0 = vld [vmem:[%s2468_s1 + $0x18] sm:$0xff]  ;;  %v77_v1 = vld [vmem:[%s2468_s1 + $0x10] sm:$0xff]  ;;  %v76_v2 = vld [vmem:[%s2468_s1 + $0x8] sm:$0xff] }
   0x2   :  { %1305 = vmatprep.subr.mxu0 %v78_v0  ;;  %1409 = vmatprep.subr.mxu1 %v78_v0  ;;  %v75_v3 = vld [vmem:[%s2468_s1] sm:$0xff]  ;;  %v12_v6 = vld [vmem:[%s2469_s0 + $0x8] sm:$0xff]  ;;  %v13_v8 = vld [vmem:[%s2469_s0 + $0x10] sm:$0xff] }
   0x3   :  { %1306 = vmatpush3.msra.mxu0 %v78_v0  ;;  %1413 = vmatpush3.msra.mxu1 %v78_v0  ;;  %v11_v4 = vld [vmem:[%s2469_s0] sm:$0xff]  ;;  %v44_v7 = vld [vmem:[%s2469_s0 + $0x108] sm:$0xff]  ;;  %v45_v9 = vld [vmem:[%s2469_s0 + $0x110] sm:$0xff] }
   0x4   :  { %1307 = vmatprep.subr.mxu0 %v77_v1  ;;  %1410 = vmatprep.subr.mxu1 %v77_v1  ;;  %v43_v5 = vld [vmem:[%s2469_s0 + $0x100] sm:$0xff]  ;;  %v14_v10 = vld [vmem:[%s2469_s0 + $0x18] sm:$0xff]  ;;  %v16_v14 = vld [vmem:[%s2469_s0 + $0x28] sm:$0xff] }
   0x5   :  { %1308 = vmatpush3.msra.mxu0 %v77_v1  ;;  %1414 = vmatpush3.msra.mxu1 %v77_v1  ;;  %v46_v11 = vld [vmem:[%s2469_s0 + $0x118] sm:$0xff]  ;;  %v15_v12 = vld [vmem:[%s2469_s0 + $0x20] sm:$0xff]  ;;  %v48_v15 = vld [vmem:[%s2469_s0 + $0x128] sm:$0xff] }
   0x6   :  { %1309 = vmatprep.subr.mxu0 %v76_v2  ;;  %1411 = vmatprep.subr.mxu1 %v76_v2  ;;  %v47_v13 = vld [vmem:[%s2469_s0 + $0x120] sm:$0xff]  ;;  %v17_v16 = vld [vmem:[%s2469_s0 + $0x30] sm:$0xff]  ;;  %v18_v18 = vld [vmem:[%s2469_s0 + $0x38] sm:$0xff] }
   0x7   :  { %1310 = vmatpush3.msra.mxu0 %v76_v2  ;;  %1415 = vmatpush3.msra.mxu1 %v76_v2  ;;  %v49_v17 = vld [vmem:[%s2469_s0 + $0x130] sm:$0xff]  ;;  %v50_v19 = vld [vmem:[%s2469_s0 + $0x138] sm:$0xff]  ;;  %v19_v20 = vld [vmem:[%s2469_s0 + $0x40] sm:$0xff] }
   0x8   :  { %1311 = vmatprep.subr.mxu0 %v75_v3  ;;  %1412 = vmatprep.subr.mxu1 %v75_v3  ;;  %v51_v21 = vld [vmem:[%s2469_s0 + $0x140] sm:$0xff]  ;;  %v20_v22 = vld [vmem:[%s2469_s0 + $0x48] sm:$0xff]  ;;  %v21_v24 = vld [vmem:[%s2469_s0 + $0x50] sm:$0xff] }
   0x9   :  { %1312 = vmatpush3.msra.mxu0 %v75_v3  ;;  %1416 = vmatpush3.msra.mxu1 %v75_v3  ;;  %v52_v23 = vld [vmem:[%s2469_s0 + $0x148] sm:$0xff]  ;;  %v53_v25 = vld [vmem:[%s2469_s0 + $0x150] sm:$0xff]  ;;  %v22_v26 = vld [vmem:[%s2469_s0 + $0x58] sm:$0xff] }
   0xa   :  { %1313 = vmatprep.mubr.msk.f32.mxu0 %vm79_vm0, %v11_v4  ;;  %1361 = vmatprep.mubr.msk.f32.mxu1 %vm79_vm0, %v43_v5  ;;  %v54_v27 = vld [vmem:[%s2469_s0 + $0x158] sm:$0xff]  ;;  %v23_v28 = vld [vmem:[%s2469_s0 + $0x60] sm:$0xff]  ;;  %v24_v30 = vld [vmem:[%s2469_s0 + $0x68] sm:$0xff] }
   0xb   :  { %1314 = vmatmul.mubr.msk.f32.vlgmr.msra.gmra.mxu0 %vm79_vm0, %v12_v6  ;;  %1362 = vmatmul.mubr.msk.f32.vlgmr.msra.gmra.mxu1 %vm79_vm0, %v44_v7  ;;  %v55_v29 = vld [vmem:[%s2469_s0 + $0x160] sm:$0xff]  ;;  %v56_v31 = vld [vmem:[%s2469_s0 + $0x168] sm:$0xff]  ;;  %v25_v32 = vld [vmem:[%s2469_s0 + $0x70] sm:$0xff] }
   0xc   :  { %1316 = vmatprep.mubr.msk.f32.mxu0 %vm79_vm0, %v13_v8  ;;  %1364 = vmatprep.mubr.msk.f32.mxu1 %vm79_vm0, %v45_v9  ;;  %v57_v33 = vld [vmem:[%s2469_s0 + $0x170] sm:$0xff]  ;;  %v26_v34 = vld [vmem:[%s2469_s0 + $0x78] sm:$0xff]  ;;  %v27_v36 = vld [vmem:[%s2469_s0 + $0x80] sm:$0xff] }
   0xd   :  { %v58_v35 = vld [vmem:[%s2469_s0 + $0x178] sm:$0xff]  ;;  %v59_v37 = vld [vmem:[%s2469_s0 + $0x180] sm:$0xff]  ;;  %v28_v38 = vld [vmem:[%s2469_s0 + $0x88] sm:$0xff] }
   0xe   :  { %v60_v39 = vld [vmem:[%s2469_s0 + $0x188] sm:$0xff]  ;;  %v29_v40 = vld [vmem:[%s2469_s0 + $0x90] sm:$0xff]  ;;  %v30_v42 = vld [vmem:[%s2469_s0 + $0x98] sm:$0xff] }
   0xf   :  { %1317 = vmatmul.mubr.msk.f32.gmra.mxu0 %vm79_vm0, %v14_v10  ;;  %1365 = vmatmul.mubr.msk.f32.gmra.mxu1 %vm79_vm0, %v46_v11  ;;  %v61_v41 = vld [vmem:[%s2469_s0 + $0x190] sm:$0xff]  ;;  %v62_v43 = vld [vmem:[%s2469_s0 + $0x198] sm:$0xff]  ;;  %v31_v44 = vld [vmem:[%s2469_s0 + $0xa0] sm:$0xff] }
  0x10   :  { %1319 = vmatprep.mubr.msk.f32.mxu0 %vm79_vm0, %v15_v12  ;;  %1367 = vmatprep.mubr.msk.f32.mxu1 %vm79_vm0, %v47_v13  ;;  %v63_v45 = vld [vmem:[%s2469_s0 + $0x1a0] sm:$0xff]  ;;  %v32_v46 = vld [vmem:[%s2469_s0 + $0xa8] sm:$0xff]  ;;  %v33_v48 = vld [vmem:[%s2469_s0 + $0xb0] sm:$0xff] }
  0x11   :  { %v64_v47 = vld [vmem:[%s2469_s0 + $0x1a8] sm:$0xff]  ;;  %v65_v49 = vld [vmem:[%s2469_s0 + $0x1b0] sm:$0xff]  ;;  %v34_v50 = vld [vmem:[%s2469_s0 + $0xb8] sm:$0xff] }
  0x12   :  { %v66_v51 = vld [vmem:[%s2469_s0 + $0x1b8] sm:$0xff]  ;;  %v35_v52 = vld [vmem:[%s2469_s0 + $0xc0] sm:$0xff]  ;;  %v36_v54 = vld [vmem:[%s2469_s0 + $0xc8] sm:$0xff] }
  0x13   :  { %1320 = vmatmul.mubr.msk.f32.gmra.mxu0 %vm79_vm0, %v16_v14  ;;  %1368 = vmatmul.mubr.msk.f32.gmra.mxu1 %vm79_vm0, %v48_v15  ;;  %v67_v53 = vld [vmem:[%s2469_s0 + $0x1c0] sm:$0xff]  ;;  %v68_v55 = vld [vmem:[%s2469_s0 + $0x1c8] sm:$0xff]  ;;  %v37_v56 = vld [vmem:[%s2469_s0 + $0xd0] sm:$0xff] }
  0x14   :  { %1322 = vmatprep.mubr.msk.f32.mxu0 %vm79_vm0, %v17_v16  ;;  %1370 = vmatprep.mubr.msk.f32.mxu1 %vm79_vm0, %v49_v17  ;;  %v69_v57 = vld [vmem:[%s2469_s0 + $0x1d0] sm:$0xff]  ;;  %v38_v58 = vld [vmem:[%s2469_s0 + $0xd8] sm:$0xff]  ;;  %v39_v60 = vld [vmem:[%s2469_s0 + $0xe0] sm:$0xff] }
  0x15   :  { %v70_v59 = vld [vmem:[%s2469_s0 + $0x1d8] sm:$0xff]  ;;  %v71_v61 = vld [vmem:[%s2469_s0 + $0x1e0] sm:$0xff]  ;;  %v40_v62 = vld [vmem:[%s2469_s0 + $0xe8] sm:$0xff] }
  0x16   :  { %v72_v63 = vld [vmem:[%s2469_s0 + $0x1e8] sm:$0xff]  ;;  %v41_v0 = vld [vmem:[%s2469_s0 + $0xf0] sm:$0xff]  ;;  %v42_v2 = vld [vmem:[%s2469_s0 + $0xf8] sm:$0xff] }
  0x17   :  { %1323 = vmatmul.mubr.msk.f32.gmra.mxu0 %vm79_vm0, %v18_v18  ;;  %1371 = vmatmul.mubr.msk.f32.gmra.mxu1 %vm79_vm0, %v50_v19  ;;  %v73_v1 = vld [vmem:[%s2469_s0 + $0x1f0] sm:$0xff]  ;;  %v74_v3 = vld [vmem:[%s2469_s0 + $0x1f8] sm:$0xff] }
  0x18   :  { %1325 = vmatprep.mubr.msk.f32.mxu0 %vm79_vm0, %v19_v20  ;;  %1373 = vmatprep.mubr.msk.f32.mxu1 %vm79_vm0, %v51_v21 }
  0x1b   :  { %1326 = vmatmul.mubr.msk.f32.gmra.mxu0 %vm79_vm0, %v20_v22  ;;  %1374 = vmatmul.mubr.msk.f32.gmra.mxu1 %vm79_vm0, %v52_v23 }
  0x1c   :  { %1328 = vmatprep.mubr.msk.f32.mxu0 %vm79_vm0, %v21_v24  ;;  %1376 = vmatprep.mubr.msk.f32.mxu1 %vm79_vm0, %v53_v25 }
  0x1f   :  { %1329 = vmatmul.mubr.msk.f32.gmra.mxu0 %vm79_vm0, %v22_v26  ;;  %1377 = vmatmul.mubr.msk.f32.gmra.mxu1 %vm79_vm0, %v54_v27 }
  0x20   :  { %1331 = vmatprep.mubr.msk.f32.mxu0 %vm79_vm0, %v23_v28  ;;  %1379 = vmatprep.mubr.msk.f32.mxu1 %vm79_vm0, %v55_v29 }
  0x23   :  { %1332 = vmatmul.mubr.msk.f32.gmra.mxu0 %vm79_vm0, %v24_v30  ;;  %1380 = vmatmul.mubr.msk.f32.gmra.mxu1 %vm79_vm0, %v56_v31 }
  0x24   :  { %1334 = vmatprep.mubr.msk.f32.mxu0 %vm79_vm0, %v25_v32  ;;  %1382 = vmatprep.mubr.msk.f32.mxu1 %vm79_vm0, %v57_v33 }
  0x27   :  { %1335 = vmatmul.mubr.msk.f32.gmra.mxu0 %vm79_vm0, %v26_v34  ;;  %1383 = vmatmul.mubr.msk.f32.gmra.mxu1 %vm79_vm0, %v58_v35 }
  0x28   :  { %1337 = vmatprep.mubr.msk.f32.mxu0 %vm79_vm0, %v27_v36  ;;  %1385 = vmatprep.mubr.msk.f32.mxu1 %vm79_vm0, %v59_v37 }
  0x2b   :  { %1338 = vmatmul.mubr.msk.f32.gmra.mxu0 %vm79_vm0, %v28_v38  ;;  %1386 = vmatmul.mubr.msk.f32.gmra.mxu1 %vm79_vm0, %v60_v39 }
  0x2c   :  { %1340 = vmatprep.mubr.msk.f32.mxu0 %vm79_vm0, %v29_v40  ;;  %1388 = vmatprep.mubr.msk.f32.mxu1 %vm79_vm0, %v61_v41 }
  0x2f   :  { %1341 = vmatmul.mubr.msk.f32.gmra.mxu0 %vm79_vm0, %v30_v42  ;;  %1389 = vmatmul.mubr.msk.f32.gmra.mxu1 %vm79_vm0, %v62_v43 }
  0x30   :  { %1343 = vmatprep.mubr.msk.f32.mxu0 %vm79_vm0, %v31_v44  ;;  %1391 = vmatprep.mubr.msk.f32.mxu1 %vm79_vm0, %v63_v45 }
  0x33   :  { %1344 = vmatmul.mubr.msk.f32.gmra.mxu0 %vm79_vm0, %v32_v46  ;;  %1392 = vmatmul.mubr.msk.f32.gmra.mxu1 %vm79_vm0, %v64_v47 }
  0x34   :  { %1346 = vmatprep.mubr.msk.f32.mxu0 %vm79_vm0, %v33_v48  ;;  %1394 = vmatprep.mubr.msk.f32.mxu1 %vm79_vm0, %v65_v49 }
  0x37   :  { %1347 = vmatmul.mubr.msk.f32.gmra.mxu0 %vm79_vm0, %v34_v50  ;;  %1395 = vmatmul.mubr.msk.f32.gmra.mxu1 %vm79_vm0, %v66_v51 }
  0x38   :  { %1349 = vmatprep.mubr.msk.f32.mxu0 %vm79_vm0, %v35_v52  ;;  %1397 = vmatprep.mubr.msk.f32.mxu1 %vm79_vm0, %v67_v53 }
  0x3b   :  { %1350 = vmatmul.mubr.msk.f32.gmra.mxu0 %vm79_vm0, %v36_v54  ;;  %1398 = vmatmul.mubr.msk.f32.gmra.mxu1 %vm79_vm0, %v68_v55 }
  0x3c   :  { %1352 = vmatprep.mubr.msk.f32.mxu0 %vm79_vm0, %v37_v56  ;;  %1400 = vmatprep.mubr.msk.f32.mxu1 %vm79_vm0, %v69_v57 }
  0x3f   :  { %1353 = vmatmul.mubr.msk.f32.gmra.mxu0 %vm79_vm0, %v38_v58  ;;  %1401 = vmatmul.mubr.msk.f32.gmra.mxu1 %vm79_vm0, %v70_v59 }
  0x40   :  { %1355 = vmatprep.mubr.msk.f32.mxu0 %vm79_vm0, %v39_v60  ;;  %1403 = vmatprep.mubr.msk.f32.mxu1 %vm79_vm0, %v71_v61 }
  0x43   :  { %1356 = vmatmul.mubr.msk.f32.gmra.mxu0 %vm79_vm0, %v40_v62  ;;  %1404 = vmatmul.mubr.msk.f32.gmra.mxu1 %vm79_vm0, %v72_v63 }
  0x44   :  { %1358 = vmatprep.mubr.msk.f32.mxu0 %vm79_vm0, %v41_v0  ;;  %1406 = vmatprep.mubr.msk.f32.mxu1 %vm79_vm0, %v73_v1 }
  0x47   :  { %1359 = vmatmul.mubr.msk.f32.gmra.mxu0 %vm79_vm0, %v42_v2  ;;  %1407 = vmatmul.mubr.msk.f32.gmra.mxu1 %vm79_vm0, %v74_v3 }
  0xcb   :  { %v1828_v4 = vpop.f32.mrf.mxu0  ;;  %v1830_v5 = vpop.f32.mrf.mxu1 }
  0xcc   :  { %v690_v6 = vmul.f32 %v1830_v5, %v1830_v5  ;;  %v658_v7 = vmul.f32 %v1828_v4, %v1828_v4 }
  0xcd   :  { %v1836_v8 = vpop.f32.mrf.mxu0  ;;  %v1838_v9 = vpop.f32.mrf.mxu1 }
  0xce   :  { %v657_v10 = vmul.f32 %v1836_v8, %v1836_v8  ;;  %v820_v11 = vsel %vm79_vm0, %v690_v6, 0.0  ;;  %v724_v12 = vsel %vm79_vm0, %v658_v7, 0.0  ;;  %v689_v18 = vmul.f32 %v1838_v9, %v1838_v9 }
  0xcf   :  { %821 = vadd.xlane.f32.xlu1 %v820_v11  ;;  %725 = vadd.xlane.f32.xlu0 %v724_v12  ;;  %v1844_v13 = vpop.f32.mrf.mxu0  ;;  %v1846_v14 = vpop.f32.mrf.mxu1 }
  0xd0   :  { %v660_v15 = vmul.f32 %v1844_v13, %v1844_v13  ;;  %v692_v16 = vmul.f32 %v1846_v14, %v1846_v14  ;;  %v721_v19 = vsel %vm79_vm0, %v657_v10, 0.0  ;;  %v817_v26 = vsel %vm79_vm0, %v689_v18, 0.0 }
  0xd1   :  { %v1852_v17 = vpop.f32.mrf.mxu0  ;;  %v1858_v21 = vpop.f32.mrf.mxu1 }
  0xd2   :  { %v730_v20 = vsel %vm79_vm0, %v660_v15, 0.0  ;;  %v826_v23 = vsel %vm79_vm0, %v692_v16, 0.0  ;;  %v659_v24 = vmul.f32 %v1852_v17, %v1852_v17  ;;  %v691_v25 = vmul.f32 %v1858_v21, %v1858_v21 }
  0xd3   :  { %722 = vadd.xlane.f32.xlu0 %v721_v19  ;;  %731 = vadd.xlane.f32.xlu1 %v730_v20  ;;  %v1860_v22 = vpop.f32.mrf.mxu0  ;;  %v1870_v28 = vpop.f32.mrf.mxu1 }
  0xd4   :  { %v662_v29 = vmul.f32 %v1860_v22, %v1860_v22  ;;  %v823_v31 = vsel %vm79_vm0, %v691_v25, 0.0  ;;  %v727_v32 = vsel %vm79_vm0, %v659_v24, 0.0  ;;  %v694_v35 = vmul.f32 %v1870_v28, %v1870_v28 }
  0xd5   :  { %v1868_v27 = vpop.f32.mrf.mxu0  ;;  %v1878_v33 = vpop.f32.mrf.mxu1 }
  0xd6   :  { %v661_v30 = vmul.f32 %v1868_v27, %v1868_v27  ;;  %v693_v36 = vmul.f32 %v1878_v33, %v1878_v33  ;;  %v736_v37 = vsel %vm79_vm0, %v662_v29, 0.0  ;;  %v832_v43 = vsel %vm79_vm0, %v694_v35, 0.0 }
  0xd7   :  { %818 = vadd.xlane.f32.xlu0 %v817_v26  ;;  %827 = vadd.xlane.f32.xlu1 %v826_v23  ;;  %v1880_v34 = vpop.f32.mrf.mxu0  ;;  %v1890_v40 = vpop.f32.mrf.mxu1 }
  0xd8   :  { %v733_v38 = vsel %vm79_vm0, %v661_v30, 0.0  ;;  %v664_v41 = vmul.f32 %v1880_v34, %v1880_v34  ;;  %v829_v44 = vsel %vm79_vm0, %v693_v36, 0.0  ;;  %v696_v47 = vmul.f32 %v1890_v40, %v1890_v40 }
  0xd9   :  { %v1888_v39 = vpop.f32.mrf.mxu0  ;;  %v1898_v45 = vpop.f32.mrf.mxu1 }
  0xda   :  { %v663_v42 = vmul.f32 %v1888_v39, %v1888_v39  ;;  %v695_v48 = vmul.f32 %v1898_v45, %v1898_v45  ;;  %v742_v49 = vsel %vm79_vm0, %v664_v41, 0.0  ;;  %v838_v55 = vsel %vm79_vm0, %v696_v47, 0.0 }
  0xdb   :  { %824 = vadd.xlane.f32.xlu0 %v823_v31  ;;  %728 = vadd.xlane.f32.xlu1 %v727_v32  ;;  %v1900_v46 = vpop.f32.mrf.mxu0  ;;  %v1910_v52 = vpop.f32.mrf.mxu1 }
  0xdc   :  { %v739_v50 = vsel %vm79_vm0, %v663_v42, 0.0  ;;  %v666_v53 = vmul.f32 %v1900_v46, %v1900_v46  ;;  %v835_v56 = vsel %vm79_vm0, %v695_v48, 0.0  ;;  %v698_v59 = vmul.f32 %v1910_v52, %v1910_v52 }
  0xdd   :  { %v1908_v51 = vpop.f32.mrf.mxu0  ;;  %v1918_v57 = vpop.f32.mrf.mxu1 }
  0xde   :  { %v665_v54 = vmul.f32 %v1908_v51, %v1908_v51  ;;  %v697_v60 = vmul.f32 %v1918_v57, %v1918_v57  ;;  %v748_v61 = vsel %vm79_vm0, %v666_v53, 0.0  ;;  %v844_v3 = vsel %vm79_vm0, %v698_v59, 0.0 }
  0xdf   :  { %737 = vadd.xlane.f32.xlu1 %v736_v37  ;;  %734 = vadd.xlane.f32.xlu0 %v733_v38  ;;  %v1920_v58 = vpop.f32.mrf.mxu0  ;;  %v1930_v0 = vpop.f32.mrf.mxu1 }
  0xe0   :  { %v745_v62 = vsel %vm79_vm0, %v665_v54, 0.0  ;;  %v668_v1 = vmul.f32 %v1920_v58, %v1920_v58  ;;  %v841_v6 = vsel %vm79_vm0, %v697_v60, 0.0  ;;  %v700_v11 = vmul.f32 %v1930_v0, %v1930_v0 }
  0xe1   :  { %v1928_v63 = vpop.f32.mrf.mxu0  ;;  %v1938_v7 = vpop.f32.mrf.mxu1 }
  0xe2   :  { %v667_v2 = vmul.f32 %v1928_v63, %v1928_v63  ;;  %v699_v12 = vmul.f32 %v1938_v7, %v1938_v7  ;;  %v754_v15 = vsel %vm79_vm0, %v668_v1, 0.0  ;;  %v850_v24 = vsel %vm79_vm0, %v700_v11, 0.0 }
  0xe3   :  { %833 = vadd.xlane.f32.xlu1 %v832_v43  ;;  %830 = vadd.xlane.f32.xlu0 %v829_v44  ;;  %v1940_v10 = vpop.f32.mrf.mxu0  ;;  %v1950_v19 = vpop.f32.mrf.mxu1 }
  0xe4   :  { %v751_v16 = vsel %vm79_vm0, %v667_v2, 0.0  ;;  %v670_v20 = vmul.f32 %v1940_v10, %v1940_v10  ;;  %v847_v25 = vsel %vm79_vm0, %v699_v12, 0.0  ;;  %v702_v30 = vmul.f32 %v1950_v19, %v1950_v19 }
  0xe5   :  { %v1948_v18 = vpop.f32.mrf.mxu0  ;;  %v1958_v26 = vpop.f32.mrf.mxu1 }
  0xe6   :  { %v669_v23 = vmul.f32 %v1948_v18, %v1948_v18  ;;  %v701_v31 = vmul.f32 %v1958_v26, %v1958_v26  ;;  %v760_v32 = vsel %vm79_vm0, %v670_v20, 0.0  ;;  %v856_v42 = vsel %vm79_vm0, %v702_v30, 0.0 }
  0xe7   :  { %743 = vadd.xlane.f32.xlu1 %v742_v49  ;;  %740 = vadd.xlane.f32.xlu0 %v739_v50  ;;  %v1960_v29 = vpop.f32.mrf.mxu0  ;;  %v1970_v37 = vpop.f32.mrf.mxu1 }
  0xe8   :  { %v757_v35 = vsel %vm79_vm0, %v669_v23, 0.0  ;;  %v672_v38 = vmul.f32 %v1960_v29, %v1960_v29  ;;  %v853_v43 = vsel %vm79_vm0, %v701_v31, 0.0  ;;  %v704_v48 = vmul.f32 %v1970_v37, %v1970_v37 }
  0xe9   :  { %v1968_v36 = vpop.f32.mrf.mxu0  ;;  %v1978_v44 = vpop.f32.mrf.mxu1 }
  0xea   :  { %v671_v41 = vmul.f32 %v1968_v36, %v1968_v36  ;;  %v703_v49 = vmul.f32 %v1978_v44, %v1978_v44  ;;  %v766_v50 = vsel %vm79_vm0, %v672_v38, 0.0  ;;  %v862_v60 = vsel %vm79_vm0, %v704_v48, 0.0 }
  0xeb   :  { %839 = vadd.xlane.f32.xlu1 %v838_v55  ;;  %836 = vadd.xlane.f32.xlu0 %v835_v56  ;;  %v1980_v47 = vpop.f32.mrf.mxu0  ;;  %v1990_v55 = vpop.f32.mrf.mxu1 }
  0xec   :  { %v763_v53 = vsel %vm79_vm0, %v671_v41, 0.0  ;;  %v674_v56 = vmul.f32 %v1980_v47, %v1980_v47  ;;  %v706_v2 = vmul.f32 %v1990_v55, %v1990_v55 }
  0xed   :  { %v1988_v54 = vpop.f32.mrf.mxu0 }
  0xee   :  { %v673_v59 = vmul.f32 %v1988_v54, %v1988_v54  ;;  %v868_v23 = vsel %vm79_vm0, %v706_v2, 0.0 }
  0xef   :  { %749 = vadd.xlane.f32.xlu1 %v748_v61  ;;  %746 = vadd.xlane.f32.xlu0 %v745_v62  ;;  %v859_v61 = vsel %vm79_vm0, %v703_v49, 0.0  ;;  %v1998_v62 = vpop.f32.mrf.mxu1  ;;  %v2000_v1 = vpop.f32.mrf.mxu0 }
  0xf0   :  { %v769_v11 = vsel %vm79_vm0, %v673_v59, 0.0 }
  0xf1   :  { %v2008_v12 = vpop.f32.mrf.mxu0 }
  0xf2   :  { %v675_v20 = vmul.f32 %v2008_v12, %v2008_v12 }
  0xf3   :  { %845 = vadd.xlane.f32.xlu1 %v844_v3  ;;  %842 = vadd.xlane.f32.xlu0 %v841_v6  ;;  %v705_v3 = vmul.f32 %v1998_v62, %v1998_v62  ;;  %v772_v6 = vsel %vm79_vm0, %v674_v56, 0.0  ;;  %v2020_v30 = vpop.f32.mrf.mxu0 }
  0xf4   :  { %v775_v38 = vsel %vm79_vm0, %v675_v20, 0.0 }
  0xf5   :  { %v2028_v41 = vpop.f32.mrf.mxu0 }
  0xf6   :  { %v677_v48 = vmul.f32 %v2028_v41, %v2028_v41 }
  0xf7   :  { %755 = vadd.xlane.f32.xlu1 %v754_v15  ;;  %752 = vadd.xlane.f32.xlu0 %v751_v16  ;;  %v2010_v15 = vpop.f32.mrf.mxu1  ;;  %v676_v16 = vmul.f32 %v2000_v1, %v2000_v1  ;;  %v2040_v56 = vpop.f32.mrf.mxu0 }
  0xf8   :  { %v708_v31 = vmul.f32 %v2010_v15, %v2010_v15  ;;  %v781_v2 = vsel %vm79_vm0, %v677_v48, 0.0 }
  0xfa   :  { %v874_v49 = vsel %vm79_vm0, %v708_v31, 0.0 }
  0xfb   :  { %851 = vadd.xlane.f32.xlu1 %v850_v24  ;;  %848 = vadd.xlane.f32.xlu0 %v847_v25  ;;  %v865_v24 = vsel %vm79_vm0, %v705_v3, 0.0  ;;  %v2018_v25 = vpop.f32.mrf.mxu1  ;;  %v2048_v3 = vpop.f32.mrf.mxu0 }
  0xfd   :  { %v2060_v31 = vpop.f32.mrf.mxu0 }
  0xfe   :  { %2487 = vst [vmem:[#allocation2_spill] sm:$0xff] %v2060_v31 }
  0xff   :  { %761 = vadd.xlane.f32.xlu1 %v760_v32  ;;  %758 = vadd.xlane.f32.xlu0 %v757_v35  ;;  %v707_v32 = vmul.f32 %v2018_v25, %v2018_v25  ;;  %v778_v35 = vsel %vm79_vm0, %v676_v16, 0.0  ;;  %v679_v16 = vmul.f32 %v2048_v3, %v2048_v3  ;;  %v2068_v48 = vpop.f32.mrf.mxu0 }
 0x100   :  { %2488 = vst [vmem:[#allocation3_spill] sm:$0xff] %v2068_v48 }
 0x103   :  { %857 = vadd.xlane.f32.xlu1 %v856_v42  ;;  %854 = vadd.xlane.f32.xlu0 %v853_v43  ;;  %v2030_v42 = vpop.f32.mrf.mxu1  ;;  %v678_v43 = vmul.f32 %v2020_v30, %v2020_v30 }
 0x104   :  { %v710_v59 = vmul.f32 %v2030_v42, %v2030_v42 }
 0x106   :  { %v880_v20 = vsel %vm79_vm0, %v710_v59, 0.0  ;;  %v681_v59 = vmul.f32 %v2068_v48, %v2068_v48 }
 0x107   :  { %767 = vadd.xlane.f32.xlu1 %v766_v50  ;;  %764 = vadd.xlane.f32.xlu0 %v763_v53  ;;  %v871_v50 = vsel %vm79_vm0, %v707_v32, 0.0  ;;  %v2038_v53 = vpop.f32.mrf.mxu1 }
 0x10b   :  { %863 = vadd.xlane.f32.xlu1 %v862_v60  ;;  %860 = vadd.xlane.f32.xlu0 %v859_v61  ;;  %v709_v60 = vmul.f32 %v2038_v53, %v2038_v53  ;;  %v784_v61 = vsel %vm79_vm0, %v678_v43, 0.0  ;;  %v787_v43 = vsel %vm79_vm0, %v679_v16, 0.0 }
 0x10f   :  { %773 = vadd.xlane.f32.xlu1 %v772_v6  ;;  %770 = vadd.xlane.f32.xlu0 %v769_v11  ;;  %v2050_v6 = vpop.f32.mrf.mxu1  ;;  %v680_v11 = vmul.f32 %v2040_v56, %v2040_v56 }
 0x110   :  { %v712_v32 = vmul.f32 %v2050_v6, %v2050_v6 }
 0x113   :  { %869 = vadd.xlane.f32.xlu1 %v868_v23  ;;  %866 = vadd.xlane.f32.xlu0 %v865_v24  ;;  %v877_v23 = vsel %vm79_vm0, %v709_v60, 0.0  ;;  %v2058_v24 = vpop.f32.mrf.mxu1  ;;  %v886_v60 = vsel %vm79_vm0, %v712_v32, 0.0 }
 0x117   :  { %779 = vadd.xlane.f32.xlu1 %v778_v35  ;;  %776 = vadd.xlane.f32.xlu0 %v775_v38  ;;  %v711_v35 = vmul.f32 %v2058_v24, %v2058_v24  ;;  %v790_v38 = vsel %vm79_vm0, %v680_v11, 0.0  ;;  %v2080_v11 = vpop.f32.mrf.mxu0 }
 0x118   :  { %2491 = vst [vmem:[#allocation6_spill] sm:$0xff] %v2080_v11 }
 0x119   :  { %v2088_v32 = vpop.f32.mrf.mxu0 }
 0x11a   :  { %2492 = vst [vmem:[#allocation7_spill] sm:$0xff] %v2088_v32 }
 0x11b   :  { %875 = vadd.xlane.f32.xlu1 %v874_v49  ;;  %872 = vadd.xlane.f32.xlu0 %v871_v50  ;;  %v2070_v49 = vpop.f32.mrf.mxu1  ;;  %v682_v50 = vmul.f32 %v2060_v31, %v2060_v31 }
 0x11c   :  { %2489 = vst [vmem:[#allocation4_spill] sm:$0xff] %v2070_v49  ;;  %v714_v16 = vmul.f32 %v2070_v49, %v2070_v49 }
 0x11f   :  { %785 = vadd.xlane.f32.xlu1 %v784_v61  ;;  %782 = vadd.xlane.f32.xlu0 %v781_v2  ;;  %v883_v61 = vsel %vm79_vm0, %v711_v35, 0.0  ;;  %v2078_v2 = vpop.f32.mrf.mxu1 }
 0x120   :  { %2490 = vst [vmem:[#allocation5_spill] sm:$0xff] %v2078_v2 }
 0x121   :  { %v2090_v35 = vpop.f32.mrf.mxu1 }
 0x122   :  { %2493 = vst [vmem:[#allocation8_spill] sm:$0xff] %v2090_v35 }
 0x123   :  { %881 = vadd.xlane.f32.xlu1 %v880_v20  ;;  %878 = vadd.xlane.f32.xlu0 %v877_v23  ;;  %v713_v20 = vmul.f32 %v2078_v2, %v2078_v2  ;;  %v796_v23 = vsel %vm79_vm0, %v682_v50, 0.0  ;;  %v2098_v50 = vpop.f32.mrf.mxu1 }
 0x124   :  { %2494 = vst [vmem:[#allocation9_spill] sm:$0xff] %v2098_v50 }
 0x125   :  { %v889_v2 = vsel %vm79_vm0, %v713_v20, 0.0  ;;  %v2110_v20 = vpop.f32.mrf.mxu1 }
 0x126   :  { %2497 = vst [vmem:[#allocation12_spill] sm:$0xff] %v2110_v20 }
 0x127   :  { %791 = vadd.xlane.f32.xlu1 %v790_v38  ;;  %788 = vadd.xlane.f32.xlu0 %v787_v43  ;;  %v793_v38 = vsel %vm79_vm0, %v681_v59, 0.0  ;;  %v684_v43 = vmul.f32 %v2080_v11, %v2080_v11  ;;  %v2100_v59 = vpop.f32.mrf.mxu0 }
 0x128   :  { %2495 = vst [vmem:[#allocation10_spill] sm:$0xff] %v2100_v59 }
 0x129   :  { %v802_v11 = vsel %vm79_vm0, %v684_v43, 0.0  ;;  %v2118_v43 = vpop.f32.mrf.mxu1 }
 0x12a   :  { %2498 = vst [vmem:[#allocation13_spill] sm:$0xff] %v2118_v43 }
 0x12b   :  { %887 = vadd.xlane.f32.xlu1 %v886_v60  ;;  %884 = vadd.xlane.f32.xlu0 %v883_v61  ;;  %v683_v60 = vmul.f32 %v2088_v32, %v2088_v32  ;;  %v892_v61 = vsel %vm79_vm0, %v714_v16, 0.0  ;;  %v2108_v16 = vpop.f32.mrf.mxu0 }
 0x12c   :  { %2496 = vst [vmem:[#allocation11_spill] sm:$0xff] %v2108_v16 }
 0x12d   :  { %v799_v32 = vsel %vm79_vm0, %v683_v60, 0.0  ;;  %v717_v60 = vmul.f32 %v2118_v43, %v2118_v43 }
 0x12f   :  { %797 = vadd.xlane.f32.xlu1 %v796_v23  ;;  %794 = vadd.xlane.f32.xlu0 %v793_v38  ;;  %v716_v23 = vmul.f32 %v2090_v35, %v2090_v35  ;;  %v715_v38 = vmul.f32 %v2098_v50, %v2098_v50  ;;  %v901_v43 = vsel %vm79_vm0, %v717_v60, 0.0 }
 0x131   :  { %v898_v35 = vsel %vm79_vm0, %v716_v23, 0.0  ;;  %v895_v50 = vsel %vm79_vm0, %v715_v38, 0.0 }
 0x133   :  { %893 = vadd.xlane.f32.xlu1 %v892_v61  ;;  %890 = vadd.xlane.f32.xlu0 %v889_v2  ;;  %v686_v2 = vmul.f32 %v2100_v59, %v2100_v59  ;;  %v685_v61 = vmul.f32 %v2108_v16, %v2108_v16 }
 0x135   :  { %v808_v59 = vsel %vm79_vm0, %v686_v2, 0.0  ;;  %v805_v16 = vsel %vm79_vm0, %v685_v61, 0.0 }
 0x137   :  { %803 = vadd.xlane.f32.xlu1 %v802_v11  ;;  %800 = vadd.xlane.f32.xlu0 %v799_v32  ;;  %v2120_v11 = vpop.f32.mrf.mxu0  ;;  %v718_v32 = vmul.f32 %v2110_v20, %v2110_v20 }
 0x138   :  { %2499 = vst [vmem:[#allocation14_spill] sm:$0xff] %v2120_v11 }
 0x139   :  { %v2128_v23 = vpop.f32.mrf.mxu0  ;;  %v904_v20 = vsel %vm79_vm0, %v718_v32, 0.0 }
 0x13a   :  { %2500 = vst [vmem:[#allocation15_spill] sm:$0xff] %v2128_v23  ;;  %v687_v38 = vmul.f32 %v2128_v23, %v2128_v23 }
 0x13b   :  { %899 = vadd.xlane.f32.xlu1 %v898_v35  ;;  %896 = vadd.xlane.f32.xlu0 %v895_v50  ;;  %v2130_v35 = vpop.f32.mrf.mxu1  ;;  %v688_v50 = vmul.f32 %v2120_v11, %v2120_v11 }
 0x13c   :  { %2501 = vst [vmem:[#allocation16_spill] sm:$0xff] %v2130_v35  ;;  %v811_v11 = vsel %vm79_vm0, %v687_v38, 0.0 }
 0x13d   :  { %v2138_v2 = vpop.f32.mrf.mxu1  ;;  %v814_v61 = vsel %vm79_vm0, %v688_v50, 0.0 }
 0x13e   :  { %2502 = vst [vmem:[#allocation17_spill] sm:$0xff] %v2138_v2 }
 0x13f   :  { %809 = vadd.xlane.f32.xlu1 %v808_v59  ;;  %806 = vadd.xlane.f32.xlu0 %v805_v16  ;;  %v720_v59 = vmul.f32 %v2130_v35, %v2130_v35  ;;  %v719_v16 = vmul.f32 %v2138_v2, %v2138_v2 }
 0x141   :  { %v910_v32 = vsel %vm79_vm0, %v720_v59, 0.0  ;;  %v907_v60 = vsel %vm79_vm0, %v719_v16, 0.0 }
 0x143   :  { %905 = vadd.xlane.f32.xlu1 %v904_v20  ;;  %902 = vadd.xlane.f32.xlu0 %v901_v43 }
 0x147   :  { %815 = vadd.xlane.f32.xlu1 %v814_v61  ;;  %812 = vadd.xlane.f32.xlu0 %v811_v11 }
 0x14b   :  { %911 = vadd.xlane.f32.xlu1 %v910_v32  ;;  %908 = vadd.xlane.f32.xlu0 %v907_v60 }
 0x158   :  { %v822_v20 = vpop.xlane.xlu1 %821  ;;  %v726_v43 = vpop.xlane.xlu0 %725 }
 0x159   :  { %v946_v23 = vmax.f32 %v822_v20, 1e-24  ;;  %v914_v49 = vmax.f32 %v726_v43, 1e-24 }
 0x15b   :  { %1417 = vrsqrt.f32 %v946_v23 }
 0x15c   :  { %1419 = vrsqrt.f32 %v914_v49  ;;  %v723_v35 = vpop.xlane.xlu0 %722  ;;  %v732_v2 = vpop.xlane.xlu1 %731 }
 0x15d   :  { %v913_v48 = vmax.f32 %v723_v35, 1e-24  ;;  %v916_v50 = vmax.f32 %v732_v2, 1e-24 }
 0x15f   :  { %1421 = vrsqrt.f32 %v913_v48 }
 0x160   :  { %1423 = vrsqrt.f32 %v916_v50  ;;  %v819_v38 = vpop.xlane.xlu0 %818  ;;  %v828_v11 = vpop.xlane.xlu1 %827 }
 0x161   :  { %v945_v61 = vmax.f32 %v819_v38, 1e-24  ;;  %v948_v59 = vmax.f32 %v828_v11, 1e-24 }
 0x163   :  { %1425 = vrsqrt.f32 %v945_v61 }
 0x164   :  { %1427 = vrsqrt.f32 %v948_v59  ;;  %v825_v16 = vpop.xlane.xlu0 %824  ;;  %v729_v32 = vpop.xlane.xlu1 %728 }
 0x165   :  { %v947_v60 = vmax.f32 %v825_v16, 1e-24  ;;  %v915_v31 = vmax.f32 %v729_v32, 1e-24 }
 0x167   :  { %1429 = vrsqrt.f32 %v947_v60 }
 0x168   :  { %v1418_v20 = vpop.eup %1417  ;;  %1431 = vrsqrt.f32 %v915_v31  ;;  %v738_v49 = vpop.xlane.xlu1 %737 }
 0x169   :  { %v735_v23 = vpop.xlane.xlu0 %734  ;;  %v1420_v43 = vpop.eup %1419  ;;  %v1074_v35 = vmul.f32 %v1418_v20, %v1830_v5  ;;  %v918_v48 = vmax.f32 %v738_v49, 1e-24 }
 0x16a   :  { %v917_v2 = vmax.f32 %v735_v23, 1e-24  ;;  %v1042_v50 = vmul.f32 %v1420_v43, %v1828_v4 }
 0x16b   :  { %1138 = vst.msk [vmem:[%s2470_s2 + $0x108] sm:$0xff] %vm79_vm0, %v1074_v35  ;;  %1433 = vrsqrt.f32 %v918_v48 }
 0x16c   :  { %v1422_v38 = vpop.eup %1421  ;;  %1106 = vst.msk [vmem:[%s2470_s2 + $0x8] sm:$0xff] %vm79_vm0, %v1042_v50  ;;  %1435 = vrsqrt.f32 %v917_v2  ;;  %v834_v31 = vpop.xlane.xlu1 %833 }
 0x16d   :  { %v831_v11 = vpop.xlane.xlu0 %830  ;;  %v1424_v5 = vpop.eup %1423  ;;  %v1041_v61 = vmul.f32 %v1422_v38, %v1836_v8  ;;  %v950_v59 = vmax.f32 %v834_v31, 1e-24 }
 0x16e   :  { %v949_v4 = vmax.f32 %v831_v11, 1e-24  ;;  %v1044_v16 = vmul.f32 %v1424_v5, %v1844_v13 }
 0x16f   :  { %1105 = vst.msk [vmem:[%s2470_s2] sm:$0xff] %vm79_vm0, %v1041_v61  ;;  %1437 = vrsqrt.f32 %v950_v59 }
 0x170   :  { %v1426_v32 = vpop.eup %1425  ;;  %1108 = vst.msk [vmem:[%s2470_s2 + $0x18] sm:$0xff] %vm79_vm0, %v1044_v16  ;;  %1439 = vrsqrt.f32 %v949_v4  ;;  %v744_v60 = vpop.xlane.xlu1 %743 }
 0x171   :  { %v741_v20 = vpop.xlane.xlu0 %740  ;;  %v1428_v8 = vpop.eup %1427  ;;  %v1073_v49 = vmul.f32 %v1426_v32, %v1838_v9  ;;  %v920_v23 = vmax.f32 %v744_v60, 1e-24 }
 0x172   :  { %v919_v13 = vmax.f32 %v741_v20, 1e-24  ;;  %v1076_v43 = vmul.f32 %v1428_v8, %v1846_v14 }
 0x173   :  { %1137 = vst.msk [vmem:[%s2470_s2 + $0x100] sm:$0xff] %vm79_vm0, %v1073_v49  ;;  %1441 = vrsqrt.f32 %v920_v23 }
 0x174   :  { %v1430_v35 = vpop.eup %1429  ;;  %1140 = vst.msk [vmem:[%s2470_s2 + $0x118] sm:$0xff] %vm79_vm0, %v1076_v43  ;;  %1443 = vrsqrt.f32 %v919_v13  ;;  %v840_v48 = vpop.xlane.xlu1 %839 }
 0x175   :  { %v837_v2 = vpop.xlane.xlu0 %836  ;;  %v1432_v9 = vpop.eup %1431  ;;  %v1075_v50 = vmul.f32 %v1430_v35, %v1858_v21  ;;  %v952_v38 = vmax.f32 %v840_v48, 1e-24 }
 0x176   :  { %v951_v14 = vmax.f32 %v837_v2, 1e-24  ;;  %v1043_v31 = vmul.f32 %v1432_v9, %v1852_v17 }
 0x177   :  { %1139 = vst.msk [vmem:[%s2470_s2 + $0x110] sm:$0xff] %vm79_vm0, %v1075_v50  ;;  %1445 = vrsqrt.f32 %v952_v38 }
 0x178   :  { %v1434_v11 = vpop.eup %1433  ;;  %1107 = vst.msk [vmem:[%s2470_s2 + $0x10] sm:$0xff] %vm79_vm0, %v1043_v31  ;;  %1447 = vrsqrt.f32 %v951_v14  ;;  %v750_v5 = vpop.xlane.xlu1 %749 }
 0x179   :  { %v747_v61 = vpop.xlane.xlu0 %746  ;;  %v1436_v21 = vpop.eup %1435  ;;  %v1046_v59 = vmul.f32 %v1434_v11, %v1860_v22  ;;  %v922_v4 = vmax.f32 %v750_v5, 1e-24 }
 0x17a   :  { %v921_v17 = vmax.f32 %v747_v61, 1e-24  ;;  %v1045_v16 = vmul.f32 %v1436_v21, %v1868_v27 }
 0x17b   :  { %1110 = vst.msk [vmem:[%s2470_s2 + $0x28] sm:$0xff] %vm79_vm0, %v1046_v59  ;;  %1449 = vrsqrt.f32 %v922_v4 }
 0x17c   :  { %v1438_v32 = vpop.eup %1437  ;;  %1109 = vst.msk [vmem:[%s2470_s2 + $0x20] sm:$0xff] %vm79_vm0, %v1045_v16  ;;  %1451 = vrsqrt.f32 %v921_v17  ;;  %v846_v60 = vpop.xlane.xlu1 %845 }
 0x17d   :  { %v843_v20 = vpop.xlane.xlu0 %842  ;;  %v1440_v22 = vpop.eup %1439  ;;  %v1078_v8 = vmul.f32 %v1438_v32, %v1870_v28  ;;  %v954_v49 = vmax.f32 %v846_v60, 1e-24 }
 0x17e   :  { %v953_v27 = vmax.f32 %v843_v20, 1e-24  ;;  %v1077_v23 = vmul.f32 %v1440_v22, %v1878_v33 }
 0x17f   :  { %1142 = vst.msk [vmem:[%s2470_s2 + $0x128] sm:$0xff] %vm79_vm0, %v1078_v8  ;;  %1453 = vrsqrt.f32 %v954_v49 }
 0x180   :  { %v1442_v13 = vpop.eup %1441  ;;  %1141 = vst.msk [vmem:[%s2470_s2 + $0x120] sm:$0xff] %vm79_vm0, %v1077_v23  ;;  %1455 = vrsqrt.f32 %v953_v27  ;;  %v756_v43 = vpop.xlane.xlu1 %755 }
 0x181   :  { %v753_v35 = vpop.xlane.xlu0 %752  ;;  %v1444_v28 = vpop.eup %1443  ;;  %v1048_v48 = vmul.f32 %v1442_v13, %v1880_v34  ;;  %v924_v2 = vmax.f32 %v756_v43, 1e-24 }
 0x182   :  { %v923_v33 = vmax.f32 %v753_v35, 1e-24  ;;  %v1047_v9 = vmul.f32 %v1444_v28, %v1888_v39 }
 0x183   :  { %1112 = vst.msk [vmem:[%s2470_s2 + $0x38] sm:$0xff] %vm79_vm0, %v1048_v48  ;;  %1457 = vrsqrt.f32 %v924_v2 }
 0x184   :  { %v1446_v50 = vpop.eup %1445  ;;  %1111 = vst.msk [vmem:[%s2470_s2 + $0x30] sm:$0xff] %vm79_vm0, %v1047_v9  ;;  %1459 = vrsqrt.f32 %v923_v33  ;;  %v852_v38 = vpop.xlane.xlu1 %851 }
 0x185   :  { %v849_v14 = vpop.xlane.xlu0 %848  ;;  %v1448_v34 = vpop.eup %1447  ;;  %v1080_v31 = vmul.f32 %v1446_v50, %v1890_v40  ;;  %v956_v11 = vmax.f32 %v852_v38, 1e-24 }
 0x186   :  { %v955_v39 = vmax.f32 %v849_v14, 1e-24  ;;  %v1079_v5 = vmul.f32 %v1448_v34, %v1898_v45 }
 0x187   :  { %1144 = vst.msk [vmem:[%s2470_s2 + $0x138] sm:$0xff] %vm79_vm0, %v1080_v31  ;;  %1461 = vrsqrt.f32 %v956_v11 }
 0x188   :  { %v1450_v61 = vpop.eup %1449  ;;  %1143 = vst.msk [vmem:[%s2470_s2 + $0x130] sm:$0xff] %vm79_vm0, %v1079_v5  ;;  %1463 = vrsqrt.f32 %v955_v39  ;;  %v762_v21 = vpop.xlane.xlu1 %761 }
 0x189   :  { %v759_v59 = vpop.xlane.xlu0 %758  ;;  %v1452_v40 = vpop.eup %1451  ;;  %v1050_v4 = vmul.f32 %v1450_v61, %v1900_v46  ;;  %v926_v17 = vmax.f32 %v762_v21, 1e-24 }
 0x18a   :  { %v925_v45 = vmax.f32 %v759_v59, 1e-24  ;;  %v1049_v16 = vmul.f32 %v1452_v40, %v1908_v51 }
 0x18b   :  { %1114 = vst.msk [vmem:[%s2470_s2 + $0x48] sm:$0xff] %vm79_vm0, %v1050_v4  ;;  %1465 = vrsqrt.f32 %v926_v17 }
 0x18c   :  { %v1454_v32 = vpop.eup %1453  ;;  %1113 = vst.msk [vmem:[%s2470_s2 + $0x40] sm:$0xff] %vm79_vm0, %v1049_v16  ;;  %1467 = vrsqrt.f32 %v925_v45  ;;  %v858_v60 = vpop.xlane.xlu1 %857 }
 0x18d   :  { %v855_v20 = vpop.xlane.xlu0 %854  ;;  %v1456_v46 = vpop.eup %1455  ;;  %v1082_v22 = vmul.f32 %v1454_v32, %v1910_v52  ;;  %v958_v8 = vmax.f32 %v858_v60, 1e-24 }
 0x18e   :  { %v957_v51 = vmax.f32 %v855_v20, 1e-24  ;;  %v1081_v49 = vmul.f32 %v1456_v46, %v1918_v57 }
 0x18f   :  { %1146 = vst.msk [vmem:[%s2470_s2 + $0x148] sm:$0xff] %vm79_vm0, %v1082_v22  ;;  %1469 = vrsqrt.f32 %v958_v8 }
 0x190   :  { %v1458_v27 = vpop.eup %1457  ;;  %1145 = vst.msk [vmem:[%s2470_s2 + $0x140] sm:$0xff] %vm79_vm0, %v1081_v49  ;;  %1471 = vrsqrt.f32 %v957_v51  ;;  %v768_v23 = vpop.xlane.xlu1 %767 }
 0x191   :  { %v765_v13 = vpop.xlane.xlu0 %764  ;;  %v1460_v52 = vpop.eup %1459  ;;  %v1052_v43 = vmul.f32 %v1458_v27, %v1920_v58  ;;  %v928_v35 = vmax.f32 %v768_v23, 1e-24 }
 0x192   :  { %v927_v57 = vmax.f32 %v765_v13, 1e-24  ;;  %v1051_v28 = vmul.f32 %v1460_v52, %v1928_v63 }
 0x193   :  { %1116 = vst.msk [vmem:[%s2470_s2 + $0x58] sm:$0xff] %vm79_vm0, %v1052_v43  ;;  %1473 = vrsqrt.f32 %v928_v35 }
 0x194   :  { %v1462_v48 = vpop.eup %1461  ;;  %1115 = vst.msk [vmem:[%s2470_s2 + $0x50] sm:$0xff] %vm79_vm0, %v1051_v28  ;;  %1475 = vrsqrt.f32 %v927_v57  ;;  %v864_v2 = vpop.xlane.xlu1 %863 }
 0x195   :  { %v861_v33 = vpop.xlane.xlu0 %860  ;;  %v1464_v58 = vpop.eup %1463  ;;  %v1084_v9 = vmul.f32 %v1462_v48, %v1930_v0  ;;  %v960_v50 = vmax.f32 %v864_v2, 1e-24 }
 0x196   :  { %v959_v63 = vmax.f32 %v861_v33, 1e-24  ;;  %v1083_v38 = vmul.f32 %v1464_v58, %v1938_v7 }
 0x197   :  { %1148 = vst.msk [vmem:[%s2470_s2 + $0x158] sm:$0xff] %vm79_vm0, %v1084_v9  ;;  %1477 = vrsqrt.f32 %v960_v50 }
 0x198   :  { %v1466_v14 = vpop.eup %1465  ;;  %1147 = vst.msk [vmem:[%s2470_s2 + $0x150] sm:$0xff] %vm79_vm0, %v1083_v38  ;;  %1479 = vrsqrt.f32 %v959_v63  ;;  %v774_v34 = vpop.xlane.xlu1 %773 }
 0x199   :  { %v771_v31 = vpop.xlane.xlu0 %770  ;;  %v1468_v0 = vpop.eup %1467  ;;  %v1054_v11 = vmul.f32 %v1466_v14, %v1940_v10  ;;  %v930_v39 = vmax.f32 %v774_v34, 1e-24 }
 0x19a   :  { %v929_v7 = vmax.f32 %v771_v31, 1e-24  ;;  %v1053_v5 = vmul.f32 %v1468_v0, %v1948_v18 }
 0x19b   :  { %1118 = vst.msk [vmem:[%s2470_s2 + $0x68] sm:$0xff] %vm79_vm0, %v1054_v11  ;;  %1481 = vrsqrt.f32 %v930_v39 }
 0x19c   :  { %v1470_v61 = vpop.eup %1469  ;;  %1117 = vst.msk [vmem:[%s2470_s2 + $0x60] sm:$0xff] %vm79_vm0, %v1053_v5  ;;  %1483 = vrsqrt.f32 %v929_v7  ;;  %v870_v21 = vpop.xlane.xlu1 %869 }
 0x19d   :  { %v867_v59 = vpop.xlane.xlu0 %866  ;;  %v1472_v10 = vpop.eup %1471  ;;  %v1086_v40 = vmul.f32 %v1470_v61, %v1950_v19  ;;  %v962_v4 = vmax.f32 %v870_v21, 1e-24 }
 0x19e   :  { %v961_v18 = vmax.f32 %v867_v59, 1e-24  ;;  %v1085_v17 = vmul.f32 %v1472_v10, %v1958_v26 }
 0x19f   :  { %1150 = vst.msk [vmem:[%s2470_s2 + $0x168] sm:$0xff] %vm79_vm0, %v1086_v40  ;;  %1485 = vrsqrt.f32 %v962_v4 }
 0x1a0   :  { %v1474_v45 = vpop.eup %1473  ;;  %1149 = vst.msk [vmem:[%s2470_s2 + $0x160] sm:$0xff] %vm79_vm0, %v1085_v17  ;;  %1487 = vrsqrt.f32 %v961_v18  ;;  %v780_v16 = vpop.xlane.xlu1 %779 }
 0x1a1   :  { %v777_v32 = vpop.xlane.xlu0 %776  ;;  %v1476_v19 = vpop.eup %1475  ;;  %v1056_v60 = vmul.f32 %v1474_v45, %v1960_v29  ;;  %v932_v20 = vmax.f32 %v780_v16, 1e-24 }
 0x1a2   :  { %v931_v26 = vmax.f32 %v777_v32, 1e-24  ;;  %v1055_v46 = vmul.f32 %v1476_v19, %v1968_v36 }
 0x1a3   :  { %1120 = vst.msk [vmem:[%s2470_s2 + $0x78] sm:$0xff] %vm79_vm0, %v1056_v60  ;;  %1489 = vrsqrt.f32 %v932_v20 }
 0x1a4   :  { %v1478_v22 = vpop.eup %1477  ;;  %1119 = vst.msk [vmem:[%s2470_s2 + $0x70] sm:$0xff] %vm79_vm0, %v1055_v46  ;;  %1491 = vrsqrt.f32 %v931_v26  ;;  %v876_v8 = vpop.xlane.xlu1 %875 }
 0x1a5   :  { %v873_v51 = vpop.xlane.xlu0 %872  ;;  %v1480_v29 = vpop.eup %1479  ;;  %v1088_v49 = vmul.f32 %v1478_v22, %v1970_v37  ;;  %v964_v27 = vmax.f32 %v876_v8, 1e-24 }
 0x1a6   :  { %v963_v36 = vmax.f32 %v873_v51, 1e-24  ;;  %v1087_v23 = vmul.f32 %v1480_v29, %v1978_v44 }
 0x1a7   :  { %1152 = vst.msk [vmem:[%s2470_s2 + $0x178] sm:$0xff] %vm79_vm0, %v1088_v49  ;;  %1493 = vrsqrt.f32 %v964_v27 }
 0x1a8   :  { %v1482_v13 = vpop.eup %1481  ;;  %1151 = vst.msk [vmem:[%s2470_s2 + $0x170] sm:$0xff] %vm79_vm0, %v1087_v23  ;;  %1495 = vrsqrt.f32 %v963_v36  ;;  %v786_v52 = vpop.xlane.xlu1 %785 }
 0x1a9   :  { %v783_v43 = vpop.xlane.xlu0 %782  ;;  %v1484_v37 = vpop.eup %1483  ;;  %v1058_v35 = vmul.f32 %v1482_v13, %v1980_v47  ;;  %v934_v57 = vmax.f32 %v786_v52, 1e-24 }
 0x1aa   :  { %v933_v44 = vmax.f32 %v783_v43, 1e-24  ;;  %v1057_v28 = vmul.f32 %v1484_v37, %v1988_v54 }
 0x1ab   :  { %1122 = vst.msk [vmem:[%s2470_s2 + $0x88] sm:$0xff] %vm79_vm0, %v1058_v35  ;;  %1497 = vrsqrt.f32 %v934_v57  ;;  %v2503_v57 = vld [vmem:[#allocation2_spill] sm:$0xff] }
 0x1ac   :  { %v1486_v48 = vpop.eup %1485  ;;  %1121 = vst.msk [vmem:[%s2470_s2 + $0x80] sm:$0xff] %vm79_vm0, %v1057_v28  ;;  %1499 = vrsqrt.f32 %v933_v44  ;;  %v882_v2 = vpop.xlane.xlu1 %881 }
 0x1ad   :  { %v879_v33 = vpop.xlane.xlu0 %878  ;;  %v1488_v47 = vpop.eup %1487  ;;  %v1090_v58 = vmul.f32 %v1486_v48, %v1990_v55  ;;  %v966_v9 = vmax.f32 %v882_v2, 1e-24  ;;  %v2504_v48 = vld [vmem:[#allocation3_spill] sm:$0xff] }
 0x1ae   :  { %v965_v54 = vmax.f32 %v879_v33, 1e-24  ;;  %v1089_v50 = vmul.f32 %v1488_v47, %v1998_v62 }
 0x1af   :  { %1154 = vst.msk [vmem:[%s2470_s2 + $0x188] sm:$0xff] %vm79_vm0, %v1090_v58  ;;  %1501 = vrsqrt.f32 %v966_v9 }
 0x1b0   :  { %v1490_v63 = vpop.eup %1489  ;;  %1153 = vst.msk [vmem:[%s2470_s2 + $0x180] sm:$0xff] %vm79_vm0, %v1089_v50  ;;  %1503 = vrsqrt.f32 %v965_v54  ;;  %v792_v38 = vpop.xlane.xlu1 %791  ;;  %v2505_v54 = vld [vmem:[#allocation4_spill] sm:$0xff] }
 0x1b1   :  { %v789_v14 = vpop.xlane.xlu0 %788  ;;  %v1492_v55 = vpop.eup %1491  ;;  %v1060_v34 = vmul.f32 %v1490_v63, %v2000_v1  ;;  %v936_v31 = vmax.f32 %v792_v38, 1e-24 }
 0x1b2   :  { %v935_v62 = vmax.f32 %v789_v14, 1e-24  ;;  %v1059_v0 = vmul.f32 %v1492_v55, %v2008_v12  ;;  %v2506_v14 = vld [vmem:[#allocation5_spill] sm:$0xff] }
 0x1b3   :  { %1124 = vst.msk [vmem:[%s2470_s2 + $0x98] sm:$0xff] %vm79_vm0, %v1060_v34  ;;  %1505 = vrsqrt.f32 %v936_v31 }
 0x1b4   :  { %v1494_v11 = vpop.eup %1493  ;;  %1123 = vst.msk [vmem:[%s2470_s2 + $0x90] sm:$0xff] %vm79_vm0, %v1059_v0  ;;  %1507 = vrsqrt.f32 %v935_v62  ;;  %v888_v39 = vpop.xlane.xlu1 %887 }
 0x1b5   :  { %v885_v7 = vpop.xlane.xlu0 %884  ;;  %v1496_v1 = vpop.eup %1495  ;;  %v1092_v5 = vmul.f32 %v1494_v11, %v2010_v15  ;;  %v968_v61 = vmax.f32 %v888_v39, 1e-24  ;;  %v2507_v11 = vld [vmem:[#allocation6_spill] sm:$0xff] }
 0x1b6   :  { %v967_v12 = vmax.f32 %v885_v7, 1e-24  ;;  %v1091_v21 = vmul.f32 %v1496_v1, %v2018_v25 }
 0x1b7   :  { %1156 = vst.msk [vmem:[%s2470_s2 + $0x198] sm:$0xff] %vm79_vm0, %v1092_v5  ;;  %1509 = vrsqrt.f32 %v968_v61  ;;  %v2508_v5 = vld [vmem:[#allocation7_spill] sm:$0xff] }
 0x1b8   :  { %v1498_v59 = vpop.eup %1497  ;;  %1155 = vst.msk [vmem:[%s2470_s2 + $0x190] sm:$0xff] %vm79_vm0, %v1091_v21  ;;  %1511 = vrsqrt.f32 %v967_v12  ;;  %v798_v10 = vpop.xlane.xlu1 %797 }
 0x1b9   :  { %v795_v40 = vpop.xlane.xlu0 %794  ;;  %v1500_v15 = vpop.eup %1499  ;;  %v1062_v4 = vmul.f32 %v1498_v59, %v2020_v30  ;;  %v938_v18 = vmax.f32 %v798_v10, 1e-24 }
 0x1ba   :  { %v937_v25 = vmax.f32 %v795_v40, 1e-24  ;;  %v1061_v17 = vmul.f32 %v1500_v15, %v2028_v41  ;;  %v2509_v40 = vld [vmem:[#allocation8_spill] sm:$0xff] }
 0x1bb   :  { %1126 = vst.msk [vmem:[%s2470_s2 + $0xa8] sm:$0xff] %vm79_vm0, %v1062_v4  ;;  %1513 = vrsqrt.f32 %v938_v18 }
 0x1bc   :  { %v1502_v45 = vpop.eup %1501  ;;  %1125 = vst.msk [vmem:[%s2470_s2 + $0xa0] sm:$0xff] %vm79_vm0, %v1061_v17  ;;  %1515 = vrsqrt.f32 %v937_v25  ;;  %v894_v16 = vpop.xlane.xlu1 %893  ;;  %v2510_v25 = vld [vmem:[#allocation9_spill] sm:$0xff] }
 0x1bd   :  { %v891_v32 = vpop.xlane.xlu0 %890  ;;  %v1504_v30 = vpop.eup %1503  ;;  %v1094_v19 = vmul.f32 %v1502_v45, %v2030_v42  ;;  %v970_v60 = vmax.f32 %v894_v16, 1e-24 }
 0x1be   :  { %v969_v41 = vmax.f32 %v891_v32, 1e-24  ;;  %v1093_v20 = vmul.f32 %v1504_v30, %v2038_v53  ;;  %v2511_v32 = vld [vmem:[#allocation10_spill] sm:$0xff] }
 0x1bf   :  { %1158 = vst.msk [vmem:[%s2470_s2 + $0x1a8] sm:$0xff] %vm79_vm0, %v1094_v19  ;;  %1517 = vrsqrt.f32 %v970_v60  ;;  %v2512_v19 = vld [vmem:[#allocation11_spill] sm:$0xff] }
 0x1c0   :  { %v1506_v26 = vpop.eup %1505  ;;  %1157 = vst.msk [vmem:[%s2470_s2 + $0x1a0] sm:$0xff] %vm79_vm0, %v1093_v20  ;;  %1519 = vrsqrt.f32 %v969_v41  ;;  %v804_v46 = vpop.xlane.xlu1 %803 }
 0x1c1   :  { %v801_v22 = vpop.xlane.xlu0 %800  ;;  %v1508_v42 = vpop.eup %1507  ;;  %v1064_v8 = vmul.f32 %v1506_v26, %v2040_v56  ;;  %v940_v51 = vmax.f32 %v804_v46, 1e-24  ;;  %v2513_v26 = vld [vmem:[#allocation12_spill] sm:$0xff] }
 0x1c2   :  { %v939_v53 = vmax.f32 %v801_v22, 1e-24  ;;  %v1063_v29 = vmul.f32 %v1508_v42, %v2048_v3  ;;  %v2514_v22 = vld [vmem:[#allocation13_spill] sm:$0xff] }
 0x1c3   :  { %1128 = vst.msk [vmem:[%s2470_s2 + $0xb8] sm:$0xff] %vm79_vm0, %v1064_v8  ;;  %1521 = vrsqrt.f32 %v940_v51 }
 0x1c4   :  { %v1510_v49 = vpop.eup %1509  ;;  %1127 = vst.msk [vmem:[%s2470_s2 + $0xb0] sm:$0xff] %vm79_vm0, %v1063_v29  ;;  %1523 = vrsqrt.f32 %v939_v53  ;;  %v900_v27 = vpop.xlane.xlu1 %899  ;;  %v2515_v53 = vld [vmem:[#allocation14_spill] sm:$0xff] }
 0x1c5   :  { %v897_v36 = vpop.xlane.xlu0 %896  ;;  %v1512_v56 = vpop.eup %1511  ;;  %v1096_v23 = vmul.f32 %v1510_v49, %v2050_v6  ;;  %v972_v13 = vmax.f32 %v900_v27, 1e-24  ;;  %v2516_v49 = vld [vmem:[#allocation15_spill] sm:$0xff] }
 0x1c6   :  { %v971_v3 = vmax.f32 %v897_v36, 1e-24  ;;  %v1095_v52 = vmul.f32 %v1512_v56, %v2058_v24 }
 0x1c7   :  { %1160 = vst.msk [vmem:[%s2470_s2 + $0x1b8] sm:$0xff] %vm79_vm0, %v1096_v23  ;;  %1525 = vrsqrt.f32 %v972_v13  ;;  %v2517_v23 = vld [vmem:[#allocation16_spill] sm:$0xff] }
 0x1c8   :  { %v1514_v43 = vpop.eup %1513  ;;  %1159 = vst.msk [vmem:[%s2470_s2 + $0x1b0] sm:$0xff] %vm79_vm0, %v1095_v52  ;;  %1527 = vrsqrt.f32 %v971_v3  ;;  %v810_v37 = vpop.xlane.xlu1 %809  ;;  %v2518_v3 = vld [vmem:[#allocation17_spill] sm:$0xff] }
 0x1c9   :  { %v807_v35 = vpop.xlane.xlu0 %806  ;;  %v1516_v6 = vpop.eup %1515  ;;  %v1066_v44 = vmul.f32 %v1514_v43, %v2503_v57  ;;  %v942_v28 = vmax.f32 %v810_v37, 1e-24 }
 0x1ca   :  { %v941_v24 = vmax.f32 %v807_v35, 1e-24  ;;  %v1065_v2 = vmul.f32 %v1516_v6, %v2504_v48 }
 0x1cb   :  { %1130 = vst.msk [vmem:[%s2470_s2 + $0xc8] sm:$0xff] %vm79_vm0, %v1066_v44  ;;  %1529 = vrsqrt.f32 %v942_v28 }
 0x1cc   :  { %v1518_v33 = vpop.eup %1517  ;;  %1129 = vst.msk [vmem:[%s2470_s2 + $0xc0] sm:$0xff] %vm79_vm0, %v1065_v2  ;;  %1531 = vrsqrt.f32 %v941_v24  ;;  %v906_v47 = vpop.xlane.xlu1 %905 }
 0x1cd   :  { %v903_v58 = vpop.xlane.xlu0 %902  ;;  %v1520_v9 = vpop.eup %1519  ;;  %v1098_v50 = vmul.f32 %v1518_v33, %v2505_v54  ;;  %v974_v63 = vmax.f32 %v906_v47, 1e-24 }
 0x1ce   :  { %v973_v38 = vmax.f32 %v903_v58, 1e-24  ;;  %v1097_v55 = vmul.f32 %v1520_v9, %v2506_v14 }
 0x1cf   :  { %1162 = vst.msk [vmem:[%s2470_s2 + $0x1c8] sm:$0xff] %vm79_vm0, %v1098_v50  ;;  %1533 = vrsqrt.f32 %v974_v63 }
 0x1d0   :  { %v1522_v34 = vpop.eup %1521  ;;  %1161 = vst.msk [vmem:[%s2470_s2 + $0x1c0] sm:$0xff] %vm79_vm0, %v1097_v55  ;;  %1535 = vrsqrt.f32 %v973_v38  ;;  %v816_v31 = vpop.xlane.xlu1 %815 }
 0x1d1   :  { %v813_v62 = vpop.xlane.xlu0 %812  ;;  %v1524_v0 = vpop.eup %1523  ;;  %v1068_v39 = vmul.f32 %v1522_v34, %v2507_v11  ;;  %v944_v7 = vmax.f32 %v816_v31, 1e-24 }
 0x1d2   :  { %v943_v1 = vmax.f32 %v813_v62, 1e-24  ;;  %v1067_v61 = vmul.f32 %v1524_v0, %v2508_v5 }
 0x1d3   :  { %1132 = vst.msk [vmem:[%s2470_s2 + $0xd8] sm:$0xff] %vm79_vm0, %v1068_v39  ;;  %1537 = vrsqrt.f32 %v944_v7 }
 0x1d4   :  { %v1526_v12 = vpop.eup %1525  ;;  %1131 = vst.msk [vmem:[%s2470_s2 + $0xd0] sm:$0xff] %vm79_vm0, %v1067_v61  ;;  %1539 = vrsqrt.f32 %v943_v1  ;;  %v912_v21 = vpop.xlane.xlu1 %911 }
 0x1d5   :  { %v909_v59 = vpop.xlane.xlu0 %908  ;;  %v1528_v10 = vpop.eup %1527  ;;  %v1100_v15 = vmul.f32 %v1526_v12, %v2509_v40  ;;  %v976_v4 = vmax.f32 %v912_v21, 1e-24 }
 0x1d6   :  { %v975_v18 = vmax.f32 %v909_v59, 1e-24  ;;  %v1099_v17 = vmul.f32 %v1528_v10, %v2510_v25 }
 0x1d7   :  { %1164 = vst.msk [vmem:[%s2470_s2 + $0x1d8] sm:$0xff] %vm79_vm0, %v1100_v15  ;;  %1541 = vrsqrt.f32 %v976_v4 }
 0x1d8   :  { %v1530_v45 = vpop.eup %1529  ;;  %1163 = vst.msk [vmem:[%s2470_s2 + $0x1d0] sm:$0xff] %vm79_vm0, %v1099_v17  ;;  %1543 = vrsqrt.f32 %v975_v18 }
 0x1d9   :  { %v1532_v16 = vpop.eup %1531  ;;  %v1070_v30 = vmul.f32 %v1530_v45, %v2511_v32 }
 0x1da   :  { %v1069_v60 = vmul.f32 %v1532_v16, %v2512_v19 }
 0x1db   :  { %1134 = vst.msk [vmem:[%s2470_s2 + $0xe8] sm:$0xff] %vm79_vm0, %v1070_v30 }
 0x1dc   :  { %v1534_v41 = vpop.eup %1533  ;;  %1133 = vst.msk [vmem:[%s2470_s2 + $0xe0] sm:$0xff] %vm79_vm0, %v1069_v60 }
 0x1dd   :  { %v1536_v20 = vpop.eup %1535  ;;  %v1102_v46 = vmul.f32 %v1534_v41, %v2513_v26 }
 0x1de   :  { %v1101_v42 = vmul.f32 %v1536_v20, %v2514_v22 }
 0x1df   :  { %1166 = vst.msk [vmem:[%s2470_s2 + $0x1e8] sm:$0xff] %vm79_vm0, %v1102_v46 }
 0x1e0   :  { %v1538_v8 = vpop.eup %1537  ;;  %1165 = vst.msk [vmem:[%s2470_s2 + $0x1e0] sm:$0xff] %vm79_vm0, %v1101_v42 }
 0x1e1   :  { %v1540_v51 = vpop.eup %1539  ;;  %v1072_v29 = vmul.f32 %v1538_v8, %v2515_v53 }
 0x1e2   :  { %v1071_v27 = vmul.f32 %v1540_v51, %v2516_v49 }
 0x1e3   :  { %1136 = vst.msk [vmem:[%s2470_s2 + $0xf8] sm:$0xff] %vm79_vm0, %v1072_v29 }
 0x1e4   :  { %v1542_v36 = vpop.eup %1541  ;;  %1135 = vst.msk [vmem:[%s2470_s2 + $0xf0] sm:$0xff] %vm79_vm0, %v1071_v27 }
 0x1e5   :  { %v1544_v56 = vpop.eup %1543  ;;  %v1104_v13 = vmul.f32 %v1542_v36, %v2517_v23 }
 0x1e6   :  { %v1103_v52 = vmul.f32 %v1544_v56, %v2518_v3 }
 0x1e7   :  { %1168 = vst.msk [vmem:[%s2470_s2 + $0x1f8] sm:$0xff] %vm79_vm0, %v1104_v13 }
 0x1e8   :  { %1167 = vst.msk [vmem:[%s2470_s2 + $0x1f0] sm:$0xff] %vm79_vm0, %v1103_v52 }

</bundles_post_ra>
